<compile_context>
chip_gen: v7x
topology: tpu7x:2x2x1
jax: 0.10.0
libtpu: 0.0.40
codegen_flags: <defaults>
</compile_context>

<pallas_src>
import math

import jax
import jax.numpy as jnp
from jax.experimental import pallas as pl
from jax.experimental.pallas import tpu as pltpu


# ------------------------------ helpers -----------------------------------
def _round_up(x, m):
    return ((x + m - 1) // m) * m


def _pad_to(arr, shape):
    pads = [(0, s - d) for d, s in zip(arr.shape, shape)]
    return jnp.pad(arr, pads)


def _resident_spec(shape, single_buffer):
    """BlockSpec for a weight slab that stays resident across the M grid."""
    if single_buffer:
        # Never re-fetched across M -> no need for double buffering.
        return pl.BlockSpec(shape, lambda i: (0, 0), pipeline_mode=pl.Buffered(1))
    return pl.BlockSpec(shape, lambda i: (0, 0))


# ----------------------------- Pallas kernels -------------------------------
def _peft_merged_kernel(x_ref, w1_ref, b1_ref, w2_ref, b2_ref, o_ref):
    """Eval-mode path: LoRA already merged into W1/W2 in the wrapper.

        h   = relu(x @ W1 + b1)        (W1 = Wq+Wk+Wv + s*(BqAq+BkAk+BvAv), T'd)
        out = h @ W2 + b2              (W2 = Wd + s*Bd Ad, T'd)
    Weights and x are bf16; accumulation, bias add and relu in f32.
    """
    x = x_ref[...]                                                     # (tm, Dp) bf16
    h = jnp.dot(x, w1_ref[...], preferred_element_type=jnp.float32) + b1_ref[...]
    h = jnp.maximum(h, 0.0).astype(w2_ref.dtype)                       # bf16 for MXU
    out = jnp.dot(h, w2_ref[...], preferred_element_type=jnp.float32) + b2_ref[...]
    o_ref[...] = out.astype(o_ref.dtype)


def _peft_lora_kernel(x_ref, w1_ref, b1_ref, a1_ref, bl1_ref,
                      w2_ref, b2_ref, a2_ref, bl2_ref, o_ref):
    """Unmerged path (kept for future train-mode dropout on the LoRA branch).

    Base q/k/v weights are pre-summed to a single (Dp, Dp) slab; the three
    LoRA-A's are stacked to (Dp, 3r) and the three (scaled) LoRA-B's to
    (3r, Dp), so the summed low-rank update is one small matmul pair.
    """
    x = x_ref[...]                                                     # (tm, Dp) bf16

    # relu(q + k + v), base + LoRA
    h = jnp.dot(x, w1_ref[...], preferred_element_type=jnp.float32) + b1_ref[...]
    mid = jnp.dot(x, a1_ref[...], preferred_element_type=jnp.float32)  # (tm, 3r)
    h = h + jnp.dot(mid.astype(bl1_ref.dtype), bl1_ref[...],
                    preferred_element_type=jnp.float32)
    h = jnp.maximum(h, 0.0).astype(w2_ref.dtype)                       # bf16 for MXU

    # dense, base + LoRA
    out = jnp.dot(h, w2_ref[...], preferred_element_type=jnp.float32) + b2_ref[...]
    mid2 = jnp.dot(h, a2_ref[...], preferred_element_type=jnp.float32)  # (tm, r)
    out = out + jnp.dot(mid2.astype(bl2_ref.dtype), bl2_ref[...],
                        preferred_element_type=jnp.float32)

    o_ref[...] = out.astype(o_ref.dtype)


# --------------------------- one-time weight prep ----------------------------
def prepare_params(params, scaling, hidden, *, merge_lora=True,
                   weight_dtype=jnp.bfloat16):
    """One-time layout prep (hoisted out of the forward hot path).

    Transposes weights to [D_in, D_out], folds `scaling` into LoRA-B, sums the
    q/k/v base weights/biases, optionally merges LoRA into the base weights
    (exact while dropout is identity), zero-pads feature dims to 128 and casts
    matmul operands to bf16 (biases stay f32 for the f32 epilogue add).
    """
    H = hidden
    Dp = _round_up(H, 128)
    f32 = jnp.float32

    def base(name):
        p = params[name]
        return (p["w"].astype(f32), p["b"].astype(f32),
                p["lora_A"].astype(f32), p["lora_B"].astype(f32))

    wq, bq, aq, Bq = base("query")
    wk, bk, ak, Bk = base("key")
    wv, bv, av, Bv = base("value")
    wd, bd, ad, Bd = base("dense")

    b1 = _pad_to((bq + bk + bv).reshape(1, H), (1, Dp))                 # f32
    b2 = _pad_to(bd.reshape(1, H), (1, Dp))                             # f32

    if merge_lora:
        # Exact in eval mode (dropout == identity): x@A.T@B.T == x@(B@A).T
        w1 = (wq + wk + wv) + scaling * (Bq @ aq + Bk @ ak + Bv @ av)
        w2 = wd + scaling * (Bd @ ad)
        args = (
            _pad_to(w1.T, (Dp, Dp)).astype(weight_dtype),
            b1,
            _pad_to(w2.T, (Dp, Dp)).astype(weight_dtype),
            b2,
        )
        return {"mode": "merged", "H": H, "Dp": Dp, "args": args}

    r = aq.shape[0]
    w1 = _pad_to((wq + wk + wv).T, (Dp, Dp)).astype(weight_dtype)       # summed base
    a1 = jnp.concatenate([_pad_to(a.T, (Dp, r)) for a in (aq, ak, av)],
                         axis=1).astype(weight_dtype)                   # (Dp, 3r)
    bl1 = jnp.concatenate([scaling * B.T for B in (Bq, Bk, Bv)], axis=0)  # (3r, H)
    bl1 = _pad_to(bl1, (3 * r, Dp)).astype(weight_dtype)                # scaling folded
    w2 = _pad_to(wd.T, (Dp, Dp)).astype(weight_dtype)
    a2 = _pad_to(ad.T, (Dp, r)).astype(weight_dtype)
    bl2 = _pad_to(scaling * Bd.T, (r, Dp)).astype(weight_dtype)
    args = (w1, b1, a1, bl1, w2, b2, a2, bl2)
    return {"mode": "lora", "H": H, "Dp": Dp, "args": args}


# ------------------------------ fused forward --------------------------------
def peft_forward(x, prepped, *, tm_max=256):
    """Equivalent of PEFTManager.forward -> modified base_model.forward.

    `prepped` comes from prepare_params() (called once, outside the hot path).
    """
    B, S, H = x.shape
    assert H == prepped["H"]
    Dp = prepped["Dp"]
    out_dtype = x.dtype
    M = B * S

    # ---- M tiling: keep >=2 grid steps when possible (v7x megacore) --------
    Mp = _round_up(M, 8)
    tm = min(tm_max, Mp)
    if Mp // tm < 2 and Mp >= 16:
        tm = _round_up(Mp // 2, 8)
    Mp = _round_up(Mp, tm)

    wdtype = prepped["args"][0].dtype
    x2d = x.reshape(M, H)
    if (Mp, Dp) != (M, H):                       # skip pad pass when aligned
        x2d = _pad_to(x2d, (Mp, Dp))
    x2d = x2d.astype(wdtype)                     # bf16 activations -> half DMA

    kernel = _peft_merged_kernel if prepped["mode"] == "merged" else _peft_lora_kernel
    grid = (Mp // tm,)

    def build(single_buffer):
        in_specs = [pl.BlockSpec((tm, Dp), lambda i: (i, 0))]           # x tile
        in_specs += [_resident_spec(a.shape, single_buffer)
                     for a in prepped["args"]]                          # resident slabs
        return pl.pallas_call(
            kernel,
            out_shape=jax.ShapeDtypeStruct((Mp, Dp), out_dtype),
            grid_spec=pltpu.PrefetchScalarGridSpec(
                num_scalar_prefetch=0,
                grid=grid,
                in_specs=in_specs,
                out_specs=pl.BlockSpec((tm, Dp), lambda i: (i, 0)),
            ),
            compiler_params=pltpu.CompilerParams(
                dimension_semantics=("parallel",),       # shard M across TCs
                vmem_limit_bytes=48 * 1024 * 1024,       # safe on v7x's 64 MiB
            ),
        )

    try:
        out = build(True)(x2d, *prepped["args"])
    except Exception:
        # Fallback if this JAX build rejects pipeline_mode=pl.Buffered(1).
        out = build(False)(x2d, *prepped["args"])

    if (Mp, Dp) != (M, H):                        # skip slice pass when aligned
        out = out[:M, :H]
    return out.reshape(B, S, H)


# ----------------------- synthetic PEFT-wrapped model -----------------------
def init_params(key, hidden=32, rank=8):
    """Deterministic init. LoRA B is given small nonzero values so the
    low-rank path is actually exercised (PyTorch inits B to zero)."""
    params = {}
    names = ["query", "key", "value", "dense"]
    keys = jax.random.split(key, len(names) * 4)
    bound = 1.0 / math.sqrt(hidden)
    for i, name in enumerate(names):
        kw, kb, ka, kB = keys[4 * i:4 * i + 4]
        params[name] = {
            "w": jax.random.uniform(kw, (hidden, hidden), jnp.float32, -bound, bound),
            "b": jax.random.uniform(kb, (hidden,), jnp.float32, -bound, bound),
            "lora_A": jax.random.uniform(ka, (rank, hidden), jnp.float32, -bound, bound),
            "lora_B": 0.01 * jax.random.normal(kB, (hidden, rank), jnp.float32),
        }
    return params


def peft_forward_ref(x, params, scaling):
    """Pure-JAX f32 reference for correctness checking."""
    B, S, H = x.shape
    x2d = x.reshape(-1, H)

    def ll(name, inp):
        p = params[name]
        base = inp @ p["w"].T + p["b"]
        lora = (inp @ p["lora_A"].T) @ p["lora_B"].T
        return base + lora * scaling

    q = ll("query", x2d)
    k = ll("key", x2d)
    v = ll("value", x2d)
    h = jnp.maximum(q + k + v, 0.0)
    return ll("dense", h).reshape(B, S, H)


# ---------------------------------- main ------------------------------------
if __name__ == "__main__":
    batch, seq, hidden, rank, alpha = 2, 8, 32, 8, 16
    scaling = alpha / rank

    key = jax.random.PRNGKey(0)
    kx, kp = jax.random.split(key)
    x = jax.random.normal(kx, (batch, seq, hidden), jnp.float32)
    params = init_params(kp, hidden=hidden, rank=rank)

    # One-time weight layout prep (hoisted out of the forward path).
    prepped_merged = prepare_params(params, scaling, hidden, merge_lora=True)
    prepped_lora = prepare_params(params, scaling, hidden, merge_lora=False)

    out = jax.block_until_ready(peft_forward(x, prepped_merged))
    out_unmerged = jax.block_until_ready(peft_forward(x, prepped_lora))

    ref = peft_forward_ref(x, params, scaling)
    assert out.shape == (batch, seq, hidden)
    # bf16 MXU path -> loosened tolerance vs the f32 reference.
    assert jnp.allclose(out, ref, atol=3e-2, rtol=3e-2)
    assert jnp.allclose(out_unmerged, ref, atol=3e-2, rtol=3e-2)
    assert jnp.allclose(out, out_unmerged, atol=3e-2, rtol=3e-2)

    print("KERNEL_OK")
</pallas_src>

<mosaic_0001>
module attributes {stable_mosaic.version = 11 : i64} {
  func.func @_peft_merged_kernel(%arg0: i32, %arg1: memref<8x128xbf16, #tpu.memory_space<vmem>>, %arg2: memref<128x128xbf16, #tpu.memory_space<vmem>>, %arg3: memref<1x128xf32, #tpu.memory_space<vmem>>, %arg4: memref<128x128xbf16, #tpu.memory_space<vmem>>, %arg5: memref<1x128xf32, #tpu.memory_space<vmem>>, %arg6: memref<8x128xf32, #tpu.memory_space<vmem>>) attributes {dimension_semantics = [#tpu.dimension_semantics<parallel>], iteration_bounds = array<i64: 2>, scalar_prefetch = 0 : i64, scratch_operands = 0 : i64, tpu.core_type = #tpu.core_type<tc>, window_params = [{transform_indices = @transform_0, window_bounds = array<i64: 8, 128>}, {pipeline_mode = #tpu.pipeline_mode<synchronous>, transform_indices = @transform_1, window_bounds = array<i64: 128, 128>}, {pipeline_mode = #tpu.pipeline_mode<synchronous>, transform_indices = @transform_2, window_bounds = array<i64: 1, 128>}, {pipeline_mode = #tpu.pipeline_mode<synchronous>, transform_indices = @transform_3, window_bounds = array<i64: 128, 128>}, {pipeline_mode = #tpu.pipeline_mode<synchronous>, transform_indices = @transform_4, window_bounds = array<i64: 1, 128>}, {transform_indices = @transform_5, window_bounds = array<i64: 8, 128>}]} {
    %c0 = arith.constant 0 : index
    %c0_0 = arith.constant 0 : index
    %0 = vector.load %arg1[%c0, %c0_0] : memref<8x128xbf16, #tpu.memory_space<vmem>>, vector<8x128xbf16>
    %c0_1 = arith.constant 0 : index
    %c0_2 = arith.constant 0 : index
    %1 = vector.load %arg2[%c0_1, %c0_2] : memref<128x128xbf16, #tpu.memory_space<vmem>>, vector<128x128xbf16>
    %cst = arith.constant dense<0.000000e+00> : vector<8x128xf32>
    %2 = tpu.matmul %0, %1, %cst {dimension_numbers = #tpu.dot_dimension_numbers<[1], [0], [0], [1], [0, 0, 1, 1], [], []>} : vector<8x128xbf16>, vector<128x128xbf16>, vector<8x128xf32> -> vector<8x128xf32>
    %c0_3 = arith.constant 0 : index
    %c0_4 = arith.constant 0 : index
    %3 = vector.load %arg3[%c0_3, %c0_4] : memref<1x128xf32, #tpu.memory_space<vmem>>, vector<1x128xf32>
    %4 = vector.broadcast %3 : vector<1x128xf32> to vector<8x128xf32>
    %5 = arith.addf %2, %4 : vector<8x128xf32>
    %cst_5 = arith.constant 0.000000e+00 : f32
    %6 = vector.broadcast %cst_5 : f32 to vector<8x128xf32>
    %7 = arith.maximumf %5, %6 : vector<8x128xf32>
    %8 = arith.truncf %7 : vector<8x128xf32> to vector<8x128xbf16>
    %c0_6 = arith.constant 0 : index
    %c0_7 = arith.constant 0 : index
    %9 = vector.load %arg4[%c0_6, %c0_7] : memref<128x128xbf16, #tpu.memory_space<vmem>>, vector<128x128xbf16>
    %cst_8 = arith.constant dense<0.000000e+00> : vector<8x128xf32>
    %10 = tpu.matmul %8, %9, %cst_8 {dimension_numbers = #tpu.dot_dimension_numbers<[1], [0], [0], [1], [0, 0, 1, 1], [], []>} : vector<8x128xbf16>, vector<128x128xbf16>, vector<8x128xf32> -> vector<8x128xf32>
    %c0_9 = arith.constant 0 : index
    %c0_10 = arith.constant 0 : index
    %11 = vector.load %arg5[%c0_9, %c0_10] : memref<1x128xf32, #tpu.memory_space<vmem>>, vector<1x128xf32>
    %12 = vector.broadcast %11 : vector<1x128xf32> to vector<8x128xf32>
    %13 = arith.addf %10, %12 : vector<8x128xf32>
    %c0_11 = arith.constant 0 : index
    %c0_12 = arith.constant 0 : index
    %14 = vector.load %arg6[%c0_11, %c0_12] : memref<8x128xf32, #tpu.memory_space<vmem>>, vector<8x128xf32>
    tpu.vector_store %arg6[%c0_11, %c0_12], %13 {strides = array<i32>} : memref<8x128xf32, #tpu.memory_space<vmem>>, vector<8x128xf32>,
    return
  }
  func.func @transform_0(%arg0: i32) -> (i32, i32) {
    %c0_i32 = arith.constant 0 : i32
    %c0_i32_0 = arith.constant 0 : i32
    return %arg0, %c0_i32 : i32, i32
  }
  func.func @transform_1(%arg0: i32) -> (i32, i32) {
    %c0_i32 = arith.constant 0 : i32
    %c0_i32_0 = arith.constant 0 : i32
    %c0_i32_1 = arith.constant 0 : i32
    return %c0_i32, %c0_i32_0 : i32, i32
  }
  func.func @transform_2(%arg0: i32) -> (i32, i32) {
    %c0_i32 = arith.constant 0 : i32
    %c0_i32_0 = arith.constant 0 : i32
    %c0_i32_1 = arith.constant 0 : i32
    return %c0_i32, %c0_i32_0 : i32, i32
  }
  func.func @transform_3(%arg0: i32) -> (i32, i32) {
    %c0_i32 = arith.constant 0 : i32
    %c0_i32_0 = arith.constant 0 : i32
    %c0_i32_1 = arith.constant 0 : i32
    return %c0_i32, %c0_i32_0 : i32, i32
  }
  func.func @transform_4(%arg0: i32) -> (i32, i32) {
    %c0_i32 = arith.constant 0 : i32
    %c0_i32_0 = arith.constant 0 : i32
    %c0_i32_1 = arith.constant 0 : i32
    return %c0_i32, %c0_i32_0 : i32, i32
  }
  func.func @transform_5(%arg0: i32) -> (i32, i32) {
    %c0_i32 = arith.constant 0 : i32
    %c0_i32_0 = arith.constant 0 : i32
    return %arg0, %c0_i32 : i32, i32
  }
}

module attributes {stable_mosaic.version = 11 : i64} {
  func.func @_peft_merged_kernel(%arg0: i32, %arg1: memref<8x128xbf16, #tpu.memory_space<vmem>>, %arg2: memref<128x128xbf16, #tpu.memory_space<vmem>>, %arg3: memref<1x128xf32, #tpu.memory_space<vmem>>, %arg4: memref<128x128xbf16, #tpu.memory_space<vmem>>, %arg5: memref<1x128xf32, #tpu.memory_space<vmem>>, %arg6: memref<8x128xf32, #tpu.memory_space<vmem>>) attributes {dimension_semantics = [#tpu.dimension_semantics<parallel>], iteration_bounds = array<i64: 2>, scalar_prefetch = 0 : i64, scratch_operands = 0 : i64, tpu.core_type = #tpu.core_type<tc>, window_params = [{transform_indices = @transform_0, window_bounds = array<i64: 8, 128>}, {pipeline_mode = #tpu.pipeline_mode<synchronous>, transform_indices = @transform_1, window_bounds = array<i64: 128, 128>}, {pipeline_mode = #tpu.pipeline_mode<synchronous>, transform_indices = @transform_2, window_bounds = array<i64: 1, 128>}, {pipeline_mode = #tpu.pipeline_mode<synchronous>, transform_indices = @transform_3, window_bounds = array<i64: 128, 128>}, {pipeline_mode = #tpu.pipeline_mode<synchronous>, transform_indices = @transform_4, window_bounds = array<i64: 1, 128>}, {transform_indices = @transform_5, window_bounds = array<i64: 8, 128>}]} {
    %c0 = arith.constant 0 : index
    %c0_0 = arith.constant 0 : index
    %0 = vector.load %arg1[%c0, %c0_0] : memref<8x128xbf16, #tpu.memory_space<vmem>>, vector<8x128xbf16>
    %c0_1 = arith.constant 0 : index
    %c0_2 = arith.constant 0 : index
    %1 = vector.load %arg2[%c0_1, %c0_2] : memref<128x128xbf16, #tpu.memory_space<vmem>>, vector<128x128xbf16>
    %cst = arith.constant dense<0.000000e+00> : vector<8x128xf32>
    %2 = tpu.matmul %0, %1, %cst {dimension_numbers = #tpu.dot_dimension_numbers<[1], [0], [0], [1], [0, 0, 1, 1], [], []>} : vector<8x128xbf16>, vector<128x128xbf16>, vector<8x128xf32> -> vector<8x128xf32>
    %c0_3 = arith.constant 0 : index
    %c0_4 = arith.constant 0 : index
    %3 = vector.load %arg3[%c0_3, %c0_4] : memref<1x128xf32, #tpu.memory_space<vmem>>, vector<1x128xf32>
    %4 = vector.broadcast %3 : vector<1x128xf32> to vector<8x128xf32>
    %5 = arith.addf %2, %4 : vector<8x128xf32>
    %cst_5 = arith.constant 0.000000e+00 : f32
    %6 = vector.broadcast %cst_5 : f32 to vector<8x128xf32>
    %7 = arith.maximumf %5, %6 : vector<8x128xf32>
    %8 = arith.truncf %7 : vector<8x128xf32> to vector<8x128xbf16>
    %c0_6 = arith.constant 0 : index
    %c0_7 = arith.constant 0 : index
    %9 = vector.load %arg4[%c0_6, %c0_7] : memref<128x128xbf16, #tpu.memory_space<vmem>>, vector<128x128xbf16>
    %cst_8 = arith.constant dense<0.000000e+00> : vector<8x128xf32>
    %10 = tpu.matmul %8, %9, %cst_8 {dimension_numbers = #tpu.dot_dimension_numbers<[1], [0], [0], [1], [0, 0, 1, 1], [], []>} : vector<8x128xbf16>, vector<128x128xbf16>, vector<8x128xf32> -> vector<8x128xf32>
    %c0_9 = arith.constant 0 : index
    %c0_10 = arith.constant 0 : index
    %11 = vector.load %arg5[%c0_9, %c0_10] : memref<1x128xf32, #tpu.memory_space<vmem>>, vector<1x128xf32>
    %12 = vector.broadcast %11 : vector<1x128xf32> to vector<8x128xf32>
    %13 = arith.addf %10, %12 : vector<8x128xf32>
    %c0_11 = arith.constant 0 : index
    %c0_12 = arith.constant 0 : index
    %14 = vector.load %arg6[%c0_11, %c0_12] : memref<8x128xf32, #tpu.memory_space<vmem>>, vector<8x128xf32>
    tpu.vector_store %arg6[%c0_11, %c0_12], %13 {strides = array<i32>} : memref<8x128xf32, #tpu.memory_space<vmem>>, vector<8x128xf32>,
    return
  }
  func.func @transform_0(%arg0: i32) -> (i32, i32) {
    %c0_i32 = arith.constant 0 : i32
    %c0_i32_0 = arith.constant 0 : i32
    return %arg0, %c0_i32 : i32, i32
  }
  func.func @transform_1(%arg0: i32) -> (i32, i32) {
    %c0_i32 = arith.constant 0 : i32
    %c0_i32_0 = arith.constant 0 : i32
    %c0_i32_1 = arith.constant 0 : i32
    return %c0_i32, %c0_i32_0 : i32, i32
  }
  func.func @transform_2(%arg0: i32) -> (i32, i32) {
    %c0_i32 = arith.constant 0 : i32
    %c0_i32_0 = arith.constant 0 : i32
    %c0_i32_1 = arith.constant 0 : i32
    return %c0_i32, %c0_i32_0 : i32, i32
  }
  func.func @transform_3(%arg0: i32) -> (i32, i32) {
    %c0_i32 = arith.constant 0 : i32
    %c0_i32_0 = arith.constant 0 : i32
    %c0_i32_1 = arith.constant 0 : i32
    return %c0_i32, %c0_i32_0 : i32, i32
  }
  func.func @transform_4(%arg0: i32) -> (i32, i32) {
    %c0_i32 = arith.constant 0 : i32
    %c0_i32_0 = arith.constant 0 : i32
    %c0_i32_1 = arith.constant 0 : i32
    return %c0_i32, %c0_i32_0 : i32, i32
  }
  func.func @transform_5(%arg0: i32) -> (i32, i32) {
    %c0_i32 = arith.constant 0 : i32
    %c0_i32_0 = arith.constant 0 : i32
    return %arg0, %c0_i32 : i32, i32
  }
}

</mosaic_0001>

<bundles_post_ra>
// kernel: tpu_custom_call.1
= control target key start
LH: loop header
LB: loop body
LE: loop exit
PB: predicated region body
PF: predicated region fallthrough
CT: control target
= control target key end

     0   :  { %10 = vsyncpa [#allocation3], 0  ;;  %s1213_s0 = inlined_call_operand.hbm [shape: bf16[16,128], index: 0, kind: input, shape index: {}]   ;;  %s1214_s1 = inlined_call_operand.hbm [shape: bf16[128,128], index: 1, kind: input, shape index: {}]   ;;  %s1215_s2 = inlined_call_operand.vmem [shape: f32[1,128], index: 2, kind: input, shape index: {}]   ;;  %s1216_s3 = inlined_call_operand.hbm [shape: bf16[128,128], index: 3, kind: input, shape index: {}]   ;;  %s1217_s4 = inlined_call_operand.vmem [shape: f32[1,128], index: 4, kind: input, shape index: {}]   ;;  %s1218_s5 = inlined_call_operand.hbm [shape: f32[16,128], index: 5, kind: output, shape index: {}]  }
   0x1   :  { %12 = vsyncpa [#allocation3 + $0x1], 0 }
   0x2   :  { %13 = vsyncpa [#allocation6], 0 }
   0x3   :  { %14 = vsyncpa [#allocation4], 0 }
   0x4   :  { %16 = vsyncpa [#allocation4 + $0x1], 0  ;;  %s974_s18 = smov 0   ;;  %s976_s19 = smov 0  }
   0x5   :  { %s978_s20 = smov 0   ;;  %s980_s21 = smov 0  }
   0x6 LB: > { %s995_s22 = sadd.s32 4294967295, %s934_s21   ;;  %s599_s23 = sadd.s32 4294967294, %s934_s21   ;;  %s934_s21 = sphi %s980_s21, %s1238_s21   ;;  %s930_s20 = sphi %s978_s20, %s1237_s20   ;;  %s926_s19 = sphi %s976_s19, %s1236_s19   ;;  %s922_s18 = sphi %s974_s18, %s1235_s18  }
   0x7   : > { %p42_p0 = scmp.ne.s32.totalorder %s926_s19, %s922_s18  ;;  %p1219_p1 = scmp.eq.s32.totalorder %s995_s22, 0 }
   0x8   : > { %p156_p3 = scmp.eq.s32.totalorder %s599_s23, 1  ;;  %p600_p5 = scmp.ge.s32.totalorder %s934_s21, 1 }
   0x9   : > { %p1004_p4 = por %p1219_p1, %p42_p0  ;;  %p163_p7 = scmp.lt.s32.totalorder %s934_s21, 3 }
   0xa   : > { %p1009_p6 = por %p156_p3, %p42_p0  ;;  %s936_s27 = smov [#allocation5]  }
   0xb   : > { %s1222_s24 = scalar_select %p1004_p4, 1, 0 }
   0xc   : > { %s1223_s25 = scalar_select %p1009_p6, 1, 0 }
   0xd   : > { %p1014_p8 = pnand %p600_p5, %p163_p7  ;;  %s175_s28 = sshll.u32 %s936_s27, 4  ;;  %s1018_s28 = int_to_ptr.vmem [resolvable:$true] %s175_s28 }
   0xe   : > { %s937_s30 = smov [#allocation7]   ;;  %s778_s9 = scalar_lea.hbm %s1214_s1, 1024 }
   0xf   : > { %p703_p9 = pneg %p1014_p8  ;;  %s191_s6 = sshll.u32 %s937_s30, 4  ;;  %s1029_s6 = int_to_ptr.vmem [resolvable:$true] %s191_s6 }
  0x10   : > { %p779_p12 = scmp.ne.s32.totalorder %s1214_s1, %s778_s9  ;;  %p785_p5 = scmp.lt.u32.totalorder %s778_s9, %s1214_s1 }
  0x11   : > { %p1025_p11 = pnand %p703_p9, %p1219_p1 }
  0x13   : > { %p780_p13 = pneg %p1025_p11 }
  0x15   : > { %p781_p0 = pnand %p780_p13, %p779_p12 }
  0x17   : > { %p782_p3 = pneg %p781_p0 }
  0x19   : > { %p787_p7 = pnand %p785_p5, %p782_p3 }
  0x1b   : > { %790 = shalt.err (!%p787_p7)
}
  0x1c   : > { %s791_s14 = scalar_lea.vmem %s1018_s28, 1024  ;;  %p799_p2 = scmp.lt.s32.totalorder %s1018_s28, %s1018_s28 }
  0x1d   : > { %p792_p9 = scmp.ne.s32.totalorder %s1018_s28, %s791_s14  ;;  %p800_p12 = scmp.lt.s32.totalorder %s791_s14, %s791_s14 }
  0x1f   : > { %p794_p10 = pnand %p792_p9, %p780_p13  ;;  %p801_p0 = por %p800_p12, %p799_p2 }
  0x21   : > { %p795_p1 = pneg %p794_p10 }
  0x23   : > { %p802_p6 = pnand %p801_p0, %p795_p1 }
  0x25   : > { %805 = shalt.err (!%p802_p6)
}
  0x26   : > { %s938_s15 = smov 64   ;;  %s939_s16 = smov 4  }
  0x27   : > { %706 = dma.hbm_to_vmem [thread:$0]  (!%p1025_p11), %s1214_s1, 1024, %s1018_s28, [#allocation6], %s938_s15, %s938_s15, %s939_s16  }
  0x28   : > { %s806_s7 = scalar_lea.hbm %s1216_s3, 1024 }
  0x29   : > { %p807_p2 = scmp.ne.s32.totalorder %s1216_s3, %s806_s7  ;;  %p813_p10 = scmp.lt.u32.totalorder %s806_s7, %s1216_s3 }
  0x2b   : > { %p809_p1 = pnand %p807_p2, %p780_p13 }
  0x2d   : > { %p810_p6 = pneg %p809_p1 }
  0x2f   : > { %p815_p3 = pnand %p813_p10, %p810_p6 }
  0x31   : > { %818 = shalt.err (!%p815_p3)
}
  0x32   : > { %s819_s28 = scalar_lea.vmem %s1029_s6, 1024  ;;  %p827_p12 = scmp.lt.s32.totalorder %s1029_s6, %s1029_s6 }
  0x33   : > { %p820_p5 = scmp.ne.s32.totalorder %s1029_s6, %s819_s28  ;;  %p828_p0 = scmp.lt.s32.totalorder %s819_s28, %s819_s28 }
  0x35   : > { %p822_p7 = pnand %p820_p5, %p780_p13  ;;  %p829_p2 = por %p828_p0, %p827_p12 }
  0x37   : > { %p823_p9 = pneg %p822_p7 }
  0x39   : > { %p830_p1 = pnand %p829_p2, %p823_p9 }
  0x3b   : > { %833 = shalt.err (!%p830_p1)
}
  0x3c   : > { %709 = dma.hbm_to_vmem [thread:$0]  (!%p1025_p11), %s1216_s3, 1024, %s1029_s6, [#allocation6], %s938_s15, %s938_s15, %s939_s16  }
  0x3d   : > { %s1084_s14 = sadd.s32 1, %s934_s21   ;;  %s29_s29 = sadd.s32 1, %s930_s20 }
  0x3e   : > { %s26_s17 = ssub.s32 %s934_s21, %s1084_s14  ;;  %p36_p13 = scmp.ne.s32.totalorder %s930_s20, %s926_s19 }
  0x3f   : > { %p27_p6 = scmp.eq.s32.totalorder %s26_s17, 0  ;;  %p37_p10 = scmp.eq.s32.totalorder %s934_s21, 0 }
  0x40   : > { %p1226_p3 = scmp.eq.s32.totalorder %s995_s22, 1  ;;  %p720_p7 = scmp.lt.s32.totalorder %s934_s21, 2 }
  0x41   : > { %s1100_s27 = scalar_select %p27_p6, %s930_s20, %s29_s29  }
  0x42   : > { %p1094_p5 = por %p1226_p3, %p36_p13  ;;  %p38_p9 = por %p37_p10, %p36_p13 }
  0x43   : > { %s208_s30 = sand.u32 1, %s930_s20   ;;  %s605_s6 = sshll.u32 %s934_s21, 6 }
  0x44   : > { %s1227_s23 = scalar_select %p1094_p5, 1, 0 }
  0x45   : > { %s604_s7 = sshll.u32 %s208_s30, 2  ;;  %s1107_s8 = scalar_lea.hbm %s1213_s0, %s605_s6 }
  0x46   : > { %s212_s9 = scalar_lea.vmem [#allocation2], %s604_s7  ;;  %p1111_p11 = pnand %p720_p7, %p38_p9 }
  0x47   : > { %s219_s10 = sshll.u32 %s212_s9, 4  ;;  %s209_s28 = scalar_lea.sflag [#allocation3], %s208_s30  ;;  %s1109_s10 = int_to_ptr.vmem [resolvable:$true] %s219_s10 }
  0x48   : > { %s834_s12 = scalar_lea.hbm %s1107_s8, 64  ;;  %p836_p0 = pneg %p1111_p11 }
  0x49   : > { %p835_p12 = scmp.ne.s32.totalorder %s1107_s8, %s834_s12  ;;  %s839_s17 = scalar_lea.hbm %s1213_s0, 128 }
  0x4a   : > { %p840_p13 = scmp.lt.u32.totalorder %s1107_s8, %s1213_s0  ;;  %p841_p6 = scmp.lt.u32.totalorder %s839_s17, %s834_s12 }
  0x4b   : > { %p837_p2 = pnand %p836_p0, %p835_p12  ;;  %p843_p3 = scmp.lt.u32.totalorder %s834_s12, %s1107_s8 }
  0x4c   : > { %p842_p10 = por %p841_p6, %p840_p13 }
  0x4d   : > { %p838_p1 = pneg %p837_p2 }
  0x4e   : > { %p844_p7 = por %p843_p3, %p842_p10 }
  0x50   : > { %p845_p9 = pnand %p844_p7, %p838_p1 }
  0x52   : > { %848 = shalt.err (!%p845_p9)
}
  0x53   : > { %s849_s30 = scalar_lea.vmem %s1109_s10, 64  ;;  %s940_s15 = smov [#allocation2]  }
  0x54   : > { %p850_p12 = scmp.ne.s32.totalorder %s1109_s10, %s849_s30  ;;  %s854_s16 = sshll.u32 %s940_s15, 4  ;;  %s855_s16 = int_to_ptr.vmem [resolvable:$false] %s854_s16 }
  0x55   : > { %s856_s9 = scalar_lea.vmem %s855_s16, 128  ;;  %p857_p4 = scmp.lt.s32.totalorder %s1109_s10, %s855_s16 }
  0x56   : > { %p852_p2 = pnand %p850_p12, %p836_p0  ;;  %p858_p13 = scmp.lt.s32.totalorder %s856_s9, %s849_s30 }
  0x58   : > { %p853_p5 = pneg %p852_p2  ;;  %p859_p6 = por %p858_p13, %p857_p4 }
  0x5a   : > { %p860_p10 = pnand %p859_p6, %p853_p5 }
  0x5c   : > { %863 = shalt.err (!%p860_p10)
}
  0x5d   : > { %713 = dma.hbm_to_vmem [thread:$0]  (!%p1111_p11), %s1107_s8, 64, %s1109_s10, %s209_s28  }
  0x5e   : > { %228 = sbr.rel (%p1014_p8) target bundleno = 585 (0x249), region = 40  ;;  %s1143_s12 = sand.u32 (!%p1014_p8), 1, %s926_s19  }
  0x5f   : > { %s607_s13 = sshll.u32 (!%p1014_p8), %s1143_s12, 2  ;;  %s231_s29 = scalar_lea.sflag (!%p1014_p8), [#allocation3], %s1143_s12 }
  0x60   : > { %s1147_s17 = scalar_lea.vmem (!%p1014_p8), [#allocation2], %s607_s13  ;;  %p1229_p4 = scmp.ne.s32.totalorder (!%p1014_p8), %s1222_s24, 0 }
  0x65   : > { %909 = dma.done.wait (%p1229_p4), %s231_s29, 64  }
  0x66   : > { %911 = vsyncadd (%p1229_p4), %s231_s29, 4294967232  ;;  %p1230_p5 = scmp.eq.s32.totalorder %s995_s22, 0 }
  0x68   : > { %913 = dma.done.wait (%p1230_p5), [#allocation6], 2048   ;;  %p1231_p8 = pmov %p1230_p5 }
  0x69   : > { %v941_v0 = vmov 0.0   ;;  %vm942_vm0 = vmmov 0   ;;  %v762_v1 = vld [vmem:[#allocation5] sm:$0xff]   ;;  %v763_v2 = vld [vmem:[#allocation5 + $0x8] sm:$0xff]   ;;  %v764_v3 = vld [vmem:[#allocation5 + $0x10] sm:$0xff]   ;;  %s610_s8 = sshll.u32 %s1143_s12, 3 }
  0x6a   : > { %915 = vsyncadd (%p1231_p8), [#allocation6], 4294965248  ;;  %651 = vmatprep.subr.bf16.mxu0 %v941_v0  ;;  %667 = vmatprep.mubr.msk.bf16.mxu0 %vm942_vm0, %v941_v0  ;;  %v770_v4 = vld [vmem:[#allocation7] sm:$0xff]   ;;  %v765_v5 = vld [vmem:[#allocation5 + $0x18] sm:$0xff]   ;;  %s630_s28 = sshll.u32 %s995_s22, 7  ;;  %s268_s7 = scalar_lea.vmem [#allocation8], %s610_s8 }
  0x6b   : > { %671 = vmatprep.subr.bf16.mxu1 %v941_v0  ;;  %687 = vmatprep.mubr.msk.bf16.mxu1 %vm942_vm0, %v941_v0  ;;  %v771_v6 = vld [vmem:[#allocation7 + $0x8] sm:$0xff]   ;;  %v766_v7 = vld [vmem:[#allocation5 + $0x20] sm:$0xff]   ;;  %v772_v8 = vld [vmem:[#allocation7 + $0x10] sm:$0xff]   ;;  %s510_s6 = sshll.u32 %s268_s7, 4  ;;  %s1169_s16 = scalar_lea.hbm %s1218_s5, %s630_s28  ;;  %s1171_s6 = int_to_ptr.vmem [resolvable:$true] %s510_s6 }
  0x6c   : > { %652 = vmatpush3.bf16.msra.mxu0 %v762_v1  ;;  %672 = vmatpush3.bf16.msra.mxu1 %v770_v4  ;;  %v767_v9 = vld [vmem:[#allocation5 + $0x28] sm:$0xff]   ;;  %v773_v10 = vld [vmem:[#allocation7 + $0x18] sm:$0xff]   ;;  %v768_v11 = vld [vmem:[#allocation5 + $0x30] sm:$0xff]   ;;  %s497_s9 = scalar_lea.sflag [#allocation4], %s1143_s12  ;;  %s864_s22 = scalar_lea.vmem %s1171_s6, 128 }
  0x6d   : > { %653 = vmatprep.subr.bf16.mxu0 %v941_v0  ;;  %673 = vmatprep.subr.bf16.mxu1 %v941_v0  ;;  %v774_v12 = vld [vmem:[#allocation7 + $0x20] sm:$0xff]   ;;  %v769_v13 = vld [vmem:[#allocation5 + $0x38] sm:$0xff]   ;;  %v775_v14 = vld [vmem:[#allocation7 + $0x28] sm:$0xff]   ;;  %p865_p11 = scmp.ne.s32.totalorder %s1171_s6, %s864_s22  ;;  %p1232_p0 = scmp.ne.s32.totalorder %s1227_s23, 0 }
  0x6e   : > { %v270_v15 = vld [vmem:[%s1147_s17] sm:$0xf]  ;;  %v776_v16 = vld [vmem:[#allocation7 + $0x30] sm:$0xff]   ;;  %s943_s13 = smov [#allocation8]  }
  0x6f   : > { %v777_v17 = vld [vmem:[#allocation7 + $0x38] sm:$0xff]   ;;  %p866_p1 = pnand %p865_p11, %p1232_p0  ;;  %s868_s29 = sshll.u32 %s943_s13, 4  ;;  %s869_s29 = int_to_ptr.vmem [resolvable:$false] %s868_s29 }
  0x70   : > { %654 = vmatpush3.bf16.msra.mxu0 %v763_v2  ;;  %674 = vmatpush3.bf16.msra.mxu1 %v771_v6  ;;  %v611_v18 = vld [vmem:[%s1215_s2] ss:$0 sm:$0xff]  ;;  %s870_s17 = scalar_lea.vmem %s869_s29, 256  ;;  %p871_p7 = scmp.lt.s32.totalorder %s1171_s6, %s869_s29 }
  0x71   : > { %655 = vmatprep.subr.bf16.mxu0 %v941_v0  ;;  %675 = vmatprep.subr.bf16.mxu1 %v941_v0  ;;  %v620_v26 = vld [vmem:[%s1217_s4] ss:$0 sm:$0xff]  ;;  %p867_p3 = pneg %p866_p1  ;;  %p872_p9 = scmp.lt.s32.totalorder %s870_s17, %s864_s22 }
  0x73   : > { %p873_p12 = por %p872_p9, %p871_p7 }
  0x74   : > { %656 = vmatpush3.bf16.msra.mxu0 %v764_v3  ;;  %676 = vmatpush3.bf16.msra.mxu1 %v772_v8 }
  0x75   : > { %657 = vmatprep.subr.bf16.mxu0 %v941_v0  ;;  %677 = vmatprep.subr.bf16.mxu1 %v941_v0  ;;  %p874_p2 = pnand %p873_p12, %p867_p3 }
  0x78   : > { %658 = vmatpush3.bf16.msra.mxu0 %v765_v5  ;;  %678 = vmatpush3.bf16.msra.mxu1 %v773_v10 }
  0x79   : > { %659 = vmatprep.subr.bf16.mxu0 %v941_v0  ;;  %679 = vmatprep.subr.bf16.mxu1 %v941_v0 }
  0x7c   : > { %660 = vmatpush3.bf16.msra.mxu0 %v766_v7  ;;  %680 = vmatpush3.bf16.msra.mxu1 %v774_v12 }
  0x7d   : > { %661 = vmatprep.subr.bf16.mxu0 %v941_v0  ;;  %681 = vmatprep.subr.bf16.mxu1 %v941_v0 }
  0x80   : > { %662 = vmatpush3.bf16.msra.mxu0 %v767_v9  ;;  %682 = vmatpush3.bf16.msra.mxu1 %v775_v14 }
  0x81   : > { %663 = vmatprep.subr.bf16.mxu0 %v941_v0  ;;  %683 = vmatprep.subr.bf16.mxu1 %v941_v0 }
  0x84   : > { %664 = vmatpush3.bf16.msra.mxu0 %v768_v11  ;;  %684 = vmatpush3.bf16.msra.mxu1 %v776_v16 }
  0x85   : > { %665 = vmatprep.subr.bf16.mxu0 %v941_v0  ;;  %685 = vmatprep.subr.bf16.mxu1 %v941_v0 }
  0x88   : > { %666 = vmatpush3.bf16.msra.mxu0 %v769_v13  ;;  %686 = vmatpush3.bf16.msra.mxu1 %v777_v17 }
  0x8b   : > { %668 = vmatmul.mubr.bf16.vlgmr.msra.gmra.mrb[0].mxu0 %v270_v15 }
 0x15e   : > { %v376_v19 = vpop.f32.mrb[0].mxu0 }
 0x15f   : > { %v377_v20 = vadd.f32 %v611_v18, %v376_v19  ;;  %v669_v21 = vpop.f32.mrb[1].mxu0 }
 0x160   : > { %v379_v22 = vpop.f32.mrb[2].mxu0 }
 0x161   : > { %v382_v23 = vmax.f32 %v377_v20, 0.0  ;;  %v670_v24 = vpop.f32.mrb[3].mxu0 }
 0x163   : > { %v383_v25 = vpack.c.bf16 %v382_v23, %v382_v23 }
 0x165   : > { %688 = vmatmul.mubr.bf16.vlgmr.msra.gmra.mrb[0].mxu1 %v383_v25 }
 0x238   : > { %v489_v27 = vpop.f32.mrb[0].mxu1 }
 0x239   : > { %v490_v28 = vadd.f32 %v620_v26, %v489_v27  ;;  %v689_v29 = vpop.f32.mrb[1].mxu1 }
 0x23a   : > { %v492_v30 = vpop.f32.mrb[2].mxu1 }
 0x23b   : > { %495 = vst [vmem:[%s268_s7] sm:$0xff] %v490_v28  ;;  %v690_v31 = vpop.f32.mrb[3].mxu1 }
 0x23c   : > { %877 = shalt.err (!%p874_p2)
}
 0x23d   : > { %s878_s12 = scalar_lea.hbm %s1169_s16, 128  ;;  %s882_s8 = scalar_lea.hbm %s1218_s5, 256 }
 0x23e   : > { %p879_p13 = scmp.ne.s32.totalorder %s1169_s16, %s878_s12  ;;  %p883_p4 = scmp.lt.u32.totalorder %s1169_s16, %s1218_s5 }
 0x23f   : > { %p884_p5 = scmp.lt.u32.totalorder %s882_s8, %s878_s12  ;;  %p886_p11 = scmp.lt.u32.totalorder %s878_s12, %s1169_s16 }
 0x240   : > { %p880_p6 = pnand %p879_p13, %p1232_p0 }
 0x241   : > { %p885_p8 = por %p884_p5, %p883_p4 }
 0x242   : > { %p881_p10 = pneg %p880_p6 }
 0x243   : > { %p887_p1 = por %p886_p11, %p885_p8 }
 0x245   : > { %p888_p3 = pnand %p887_p1, %p881_p10 }
 0x247   : > { %891 = shalt.err (!%p888_p3)
}
 0x248   : > { %701 = dma.vmem_to_hbm [thread:$0]  (%p1232_p0), %s1171_s6, 128, %s1169_s16, %s497_s9  }
 0x249 PF: > { %s522_s28 = sand.u32 1, %s922_s18   ;;  %p1233_p7 = scmp.ne.s32.totalorder %s1223_s25, 0 }
 0x24a   : > { %p1234_p9 = scmp.ge.s32.totalorder %s934_s21, 2  ;;  %s523_s7 = scalar_lea.sflag [#allocation4], %s522_s28 }
 0x24c   : > { %p715_p12 = pnand %p1234_p9, %p1233_p7 }
 0x24e   : > { %917 = dma.done.wait (!%p715_p12), %s523_s7, 128  }
 0x24f   : > { %919 = vsyncadd (!%p715_p12), %s523_s7, 4294967168  ;;  %p19_p2 = scmp.ge.s32.totalorder %s1084_s14, 4   ;;  %s1235_s18 = smov %s926_s19 }
 0x250   : > { %s1236_s19 = smov %s930_s20  ;;  %s1237_s20 = smov %s1100_s27 }
 0x251   : > { %s1238_s21 = smov %s1084_s14  ;;  %21 = sbr.rel (!%p19_p2) target bundleno = 6 (0x6), region = 93 }
 0x258   :  { %528 = vsyncpa [#allocation3], 1 }
 0x259   :  { %530 = vsyncpa [#allocation3 + $0x1], 1 }
 0x25a   :  { %531 = vsyncpa [#allocation6], 1 }
 0x25b   :  { %532 = vsyncpa [#allocation4], 1 }
 0x25c   :  { %534 = vsyncpa [#allocation4 + $0x1], 1 }

// kernel: tpu_custom_call.1
= control target key start
LH: loop header
LB: loop body
LE: loop exit
PB: predicated region body
PF: predicated region fallthrough
CT: control target
= control target key end

     0   :  { %10 = vsyncpa [#allocation3], 0  ;;  %s1213_s0 = inlined_call_operand.hbm [shape: bf16[16,128], index: 0, kind: input, shape index: {}]   ;;  %s1214_s1 = inlined_call_operand.hbm [shape: bf16[128,128], index: 1, kind: input, shape index: {}]   ;;  %s1215_s2 = inlined_call_operand.vmem [shape: f32[1,128], index: 2, kind: input, shape index: {}]   ;;  %s1216_s3 = inlined_call_operand.hbm [shape: bf16[128,128], index: 3, kind: input, shape index: {}]   ;;  %s1217_s4 = inlined_call_operand.vmem [shape: f32[1,128], index: 4, kind: input, shape index: {}]   ;;  %s1218_s5 = inlined_call_operand.hbm [shape: f32[16,128], index: 5, kind: output, shape index: {}]  }
   0x1   :  { %12 = vsyncpa [#allocation3 + $0x1], 0 }
   0x2   :  { %13 = vsyncpa [#allocation6], 0 }
   0x3   :  { %14 = vsyncpa [#allocation4], 0 }
   0x4   :  { %16 = vsyncpa [#allocation4 + $0x1], 0  ;;  %s974_s18 = smov 0   ;;  %s976_s19 = smov 0  }
   0x5   :  { %s978_s20 = smov 0   ;;  %s980_s21 = smov 0  }
   0x6 LB: > { %s995_s22 = sadd.s32 4294967295, %s934_s21   ;;  %s599_s23 = sadd.s32 4294967294, %s934_s21   ;;  %s934_s21 = sphi %s980_s21, %s1238_s21   ;;  %s930_s20 = sphi %s978_s20, %s1237_s20   ;;  %s926_s19 = sphi %s976_s19, %s1236_s19   ;;  %s922_s18 = sphi %s974_s18, %s1235_s18  }
   0x7   : > { %p42_p0 = scmp.ne.s32.totalorder %s926_s19, %s922_s18  ;;  %p1219_p1 = scmp.eq.s32.totalorder %s995_s22, 0 }
   0x8   : > { %p156_p3 = scmp.eq.s32.totalorder %s599_s23, 1  ;;  %p600_p5 = scmp.ge.s32.totalorder %s934_s21, 1 }
   0x9   : > { %p1004_p4 = por %p1219_p1, %p42_p0  ;;  %p163_p7 = scmp.lt.s32.totalorder %s934_s21, 3 }
   0xa   : > { %p1009_p6 = por %p156_p3, %p42_p0  ;;  %s936_s27 = smov [#allocation5]  }
   0xb   : > { %s1222_s24 = scalar_select %p1004_p4, 1, 0 }
   0xc   : > { %s1223_s25 = scalar_select %p1009_p6, 1, 0 }
   0xd   : > { %p1014_p8 = pnand %p600_p5, %p163_p7  ;;  %s175_s28 = sshll.u32 %s936_s27, 4  ;;  %s1018_s28 = int_to_ptr.vmem [resolvable:$true] %s175_s28 }
   0xe   : > { %s937_s30 = smov [#allocation7]   ;;  %s778_s9 = scalar_lea.hbm %s1214_s1, 1024 }
   0xf   : > { %p703_p9 = pneg %p1014_p8  ;;  %s191_s6 = sshll.u32 %s937_s30, 4  ;;  %s1029_s6 = int_to_ptr.vmem [resolvable:$true] %s191_s6 }
  0x10   : > { %p779_p12 = scmp.ne.s32.totalorder %s1214_s1, %s778_s9  ;;  %p785_p5 = scmp.lt.u32.totalorder %s778_s9, %s1214_s1 }
  0x11   : > { %p1025_p11 = pnand %p703_p9, %p1219_p1 }
  0x13   : > { %p780_p13 = pneg %p1025_p11 }
  0x15   : > { %p781_p0 = pnand %p780_p13, %p779_p12 }
  0x17   : > { %p782_p3 = pneg %p781_p0 }
  0x19   : > { %p787_p7 = pnand %p785_p5, %p782_p3 }
  0x1b   : > { %790 = shalt.err (!%p787_p7)
}
  0x1c   : > { %s791_s14 = scalar_lea.vmem %s1018_s28, 1024  ;;  %p799_p2 = scmp.lt.s32.totalorder %s1018_s28, %s1018_s28 }
  0x1d   : > { %p792_p9 = scmp.ne.s32.totalorder %s1018_s28, %s791_s14  ;;  %p800_p12 = scmp.lt.s32.totalorder %s791_s14, %s791_s14 }
  0x1f   : > { %p794_p10 = pnand %p792_p9, %p780_p13  ;;  %p801_p0 = por %p800_p12, %p799_p2 }
  0x21   : > { %p795_p1 = pneg %p794_p10 }
  0x23   : > { %p802_p6 = pnand %p801_p0, %p795_p1 }
  0x25   : > { %805 = shalt.err (!%p802_p6)
}
  0x26   : > { %s938_s15 = smov 64   ;;  %s939_s16 = smov 4  }
  0x27   : > { %706 = dma.hbm_to_vmem [thread:$0]  (!%p1025_p11), %s1214_s1, 1024, %s1018_s28, [#allocation6], %s938_s15, %s938_s15, %s939_s16  }
  0x28   : > { %s806_s7 = scalar_lea.hbm %s1216_s3, 1024 }
  0x29   : > { %p807_p2 = scmp.ne.s32.totalorder %s1216_s3, %s806_s7  ;;  %p813_p10 = scmp.lt.u32.totalorder %s806_s7, %s1216_s3 }
  0x2b   : > { %p809_p1 = pnand %p807_p2, %p780_p13 }
  0x2d   : > { %p810_p6 = pneg %p809_p1 }
  0x2f   : > { %p815_p3 = pnand %p813_p10, %p810_p6 }
  0x31   : > { %818 = shalt.err (!%p815_p3)
}
  0x32   : > { %s819_s28 = scalar_lea.vmem %s1029_s6, 1024  ;;  %p827_p12 = scmp.lt.s32.totalorder %s1029_s6, %s1029_s6 }
  0x33   : > { %p820_p5 = scmp.ne.s32.totalorder %s1029_s6, %s819_s28  ;;  %p828_p0 = scmp.lt.s32.totalorder %s819_s28, %s819_s28 }
  0x35   : > { %p822_p7 = pnand %p820_p5, %p780_p13  ;;  %p829_p2 = por %p828_p0, %p827_p12 }
  0x37   : > { %p823_p9 = pneg %p822_p7 }
  0x39   : > { %p830_p1 = pnand %p829_p2, %p823_p9 }
  0x3b   : > { %833 = shalt.err (!%p830_p1)
}
  0x3c   : > { %709 = dma.hbm_to_vmem [thread:$0]  (!%p1025_p11), %s1216_s3, 1024, %s1029_s6, [#allocation6], %s938_s15, %s938_s15, %s939_s16  }
  0x3d   : > { %s1084_s14 = sadd.s32 1, %s934_s21   ;;  %s29_s29 = sadd.s32 1, %s930_s20 }
  0x3e   : > { %s26_s17 = ssub.s32 %s934_s21, %s1084_s14  ;;  %p36_p13 = scmp.ne.s32.totalorder %s930_s20, %s926_s19 }
  0x3f   : > { %p27_p6 = scmp.eq.s32.totalorder %s26_s17, 0  ;;  %p37_p10 = scmp.eq.s32.totalorder %s934_s21, 0 }
  0x40   : > { %p1226_p3 = scmp.eq.s32.totalorder %s995_s22, 1  ;;  %p720_p7 = scmp.lt.s32.totalorder %s934_s21, 2 }
  0x41   : > { %s1100_s27 = scalar_select %p27_p6, %s930_s20, %s29_s29  }
  0x42   : > { %p1094_p5 = por %p1226_p3, %p36_p13  ;;  %p38_p9 = por %p37_p10, %p36_p13 }
  0x43   : > { %s208_s30 = sand.u32 1, %s930_s20   ;;  %s605_s6 = sshll.u32 %s934_s21, 6 }
  0x44   : > { %s1227_s23 = scalar_select %p1094_p5, 1, 0 }
  0x45   : > { %s604_s7 = sshll.u32 %s208_s30, 2  ;;  %s1107_s8 = scalar_lea.hbm %s1213_s0, %s605_s6 }
  0x46   : > { %s212_s9 = scalar_lea.vmem [#allocation2], %s604_s7  ;;  %p1111_p11 = pnand %p720_p7, %p38_p9 }
  0x47   : > { %s219_s10 = sshll.u32 %s212_s9, 4  ;;  %s209_s28 = scalar_lea.sflag [#allocation3], %s208_s30  ;;  %s1109_s10 = int_to_ptr.vmem [resolvable:$true] %s219_s10 }
  0x48   : > { %s834_s12 = scalar_lea.hbm %s1107_s8, 64  ;;  %p836_p0 = pneg %p1111_p11 }
  0x49   : > { %p835_p12 = scmp.ne.s32.totalorder %s1107_s8, %s834_s12  ;;  %s839_s17 = scalar_lea.hbm %s1213_s0, 128 }
  0x4a   : > { %p840_p13 = scmp.lt.u32.totalorder %s1107_s8, %s1213_s0  ;;  %p841_p6 = scmp.lt.u32.totalorder %s839_s17, %s834_s12 }
  0x4b   : > { %p837_p2 = pnand %p836_p0, %p835_p12  ;;  %p843_p3 = scmp.lt.u32.totalorder %s834_s12, %s1107_s8 }
  0x4c   : > { %p842_p10 = por %p841_p6, %p840_p13 }
  0x4d   : > { %p838_p1 = pneg %p837_p2 }
  0x4e   : > { %p844_p7 = por %p843_p3, %p842_p10 }
  0x50   : > { %p845_p9 = pnand %p844_p7, %p838_p1 }
  0x52   : > { %848 = shalt.err (!%p845_p9)
}
  0x53   : > { %s849_s30 = scalar_lea.vmem %s1109_s10, 64  ;;  %s940_s15 = smov [#allocation2]  }
  0x54   : > { %p850_p12 = scmp.ne.s32.totalorder %s1109_s10, %s849_s30  ;;  %s854_s16 = sshll.u32 %s940_s15, 4  ;;  %s855_s16 = int_to_ptr.vmem [resolvable:$false] %s854_s16 }
  0x55   : > { %s856_s9 = scalar_lea.vmem %s855_s16, 128  ;;  %p857_p4 = scmp.lt.s32.totalorder %s1109_s10, %s855_s16 }
  0x56   : > { %p852_p2 = pnand %p850_p12, %p836_p0  ;;  %p858_p13 = scmp.lt.s32.totalorder %s856_s9, %s849_s30 }
  0x58   : > { %p853_p5 = pneg %p852_p2  ;;  %p859_p6 = por %p858_p13, %p857_p4 }
  0x5a   : > { %p860_p10 = pnand %p859_p6, %p853_p5 }
  0x5c   : > { %863 = shalt.err (!%p860_p10)
}
  0x5d   : > { %713 = dma.hbm_to_vmem [thread:$0]  (!%p1111_p11), %s1107_s8, 64, %s1109_s10, %s209_s28  }
  0x5e   : > { %228 = sbr.rel (%p1014_p8) target bundleno = 585 (0x249), region = 40  ;;  %s1143_s12 = sand.u32 (!%p1014_p8), 1, %s926_s19  }
  0x5f   : > { %s607_s13 = sshll.u32 (!%p1014_p8), %s1143_s12, 2  ;;  %s231_s29 = scalar_lea.sflag (!%p1014_p8), [#allocation3], %s1143_s12 }
  0x60   : > { %s1147_s17 = scalar_lea.vmem (!%p1014_p8), [#allocation2], %s607_s13  ;;  %p1229_p4 = scmp.ne.s32.totalorder (!%p1014_p8), %s1222_s24, 0 }
  0x65   : > { %909 = dma.done.wait (%p1229_p4), %s231_s29, 64  }
  0x66   : > { %911 = vsyncadd (%p1229_p4), %s231_s29, 4294967232  ;;  %p1230_p5 = scmp.eq.s32.totalorder %s995_s22, 0 }
  0x68   : > { %913 = dma.done.wait (%p1230_p5), [#allocation6], 2048   ;;  %p1231_p8 = pmov %p1230_p5 }
  0x69   : > { %v941_v0 = vmov 0.0   ;;  %vm942_vm0 = vmmov 0   ;;  %v762_v1 = vld [vmem:[#allocation5] sm:$0xff]   ;;  %v763_v2 = vld [vmem:[#allocation5 + $0x8] sm:$0xff]   ;;  %v764_v3 = vld [vmem:[#allocation5 + $0x10] sm:$0xff]   ;;  %s610_s8 = sshll.u32 %s1143_s12, 3 }
  0x6a   : > { %915 = vsyncadd (%p1231_p8), [#allocation6], 4294965248  ;;  %651 = vmatprep.subr.bf16.mxu0 %v941_v0  ;;  %667 = vmatprep.mubr.msk.bf16.mxu0 %vm942_vm0, %v941_v0  ;;  %v770_v4 = vld [vmem:[#allocation7] sm:$0xff]   ;;  %v765_v5 = vld [vmem:[#allocation5 + $0x18] sm:$0xff]   ;;  %s630_s28 = sshll.u32 %s995_s22, 7  ;;  %s268_s7 = scalar_lea.vmem [#allocation8], %s610_s8 }
  0x6b   : > { %671 = vmatprep.subr.bf16.mxu1 %v941_v0  ;;  %687 = vmatprep.mubr.msk.bf16.mxu1 %vm942_vm0, %v941_v0  ;;  %v771_v6 = vld [vmem:[#allocation7 + $0x8] sm:$0xff]   ;;  %v766_v7 = vld [vmem:[#allocation5 + $0x20] sm:$0xff]   ;;  %v772_v8 = vld [vmem:[#allocation7 + $0x10] sm:$0xff]   ;;  %s510_s6 = sshll.u32 %s268_s7, 4  ;;  %s1169_s16 = scalar_lea.hbm %s1218_s5, %s630_s28  ;;  %s1171_s6 = int_to_ptr.vmem [resolvable:$true] %s510_s6 }
  0x6c   : > { %652 = vmatpush3.bf16.msra.mxu0 %v762_v1  ;;  %672 = vmatpush3.bf16.msra.mxu1 %v770_v4  ;;  %v767_v9 = vld [vmem:[#allocation5 + $0x28] sm:$0xff]   ;;  %v773_v10 = vld [vmem:[#allocation7 + $0x18] sm:$0xff]   ;;  %v768_v11 = vld [vmem:[#allocation5 + $0x30] sm:$0xff]   ;;  %s497_s9 = scalar_lea.sflag [#allocation4], %s1143_s12  ;;  %s864_s22 = scalar_lea.vmem %s1171_s6, 128 }
  0x6d   : > { %653 = vmatprep.subr.bf16.mxu0 %v941_v0  ;;  %673 = vmatprep.subr.bf16.mxu1 %v941_v0  ;;  %v774_v12 = vld [vmem:[#allocation7 + $0x20] sm:$0xff]   ;;  %v769_v13 = vld [vmem:[#allocation5 + $0x38] sm:$0xff]   ;;  %v775_v14 = vld [vmem:[#allocation7 + $0x28] sm:$0xff]   ;;  %p865_p11 = scmp.ne.s32.totalorder %s1171_s6, %s864_s22  ;;  %p1232_p0 = scmp.ne.s32.totalorder %s1227_s23, 0 }
  0x6e   : > { %v270_v15 = vld [vmem:[%s1147_s17] sm:$0xf]  ;;  %v776_v16 = vld [vmem:[#allocation7 + $0x30] sm:$0xff]   ;;  %s943_s13 = smov [#allocation8]  }
  0x6f   : > { %v777_v17 = vld [vmem:[#allocation7 + $0x38] sm:$0xff]   ;;  %p866_p1 = pnand %p865_p11, %p1232_p0  ;;  %s868_s29 = sshll.u32 %s943_s13, 4  ;;  %s869_s29 = int_to_ptr.vmem [resolvable:$false] %s868_s29 }
  0x70   : > { %654 = vmatpush3.bf16.msra.mxu0 %v763_v2  ;;  %674 = vmatpush3.bf16.msra.mxu1 %v771_v6  ;;  %v611_v18 = vld [vmem:[%s1215_s2] ss:$0 sm:$0xff]  ;;  %s870_s17 = scalar_lea.vmem %s869_s29, 256  ;;  %p871_p7 = scmp.lt.s32.totalorder %s1171_s6, %s869_s29 }
  0x71   : > { %655 = vmatprep.subr.bf16.mxu0 %v941_v0  ;;  %675 = vmatprep.subr.bf16.mxu1 %v941_v0  ;;  %v620_v26 = vld [vmem:[%s1217_s4] ss:$0 sm:$0xff]  ;;  %p867_p3 = pneg %p866_p1  ;;  %p872_p9 = scmp.lt.s32.totalorder %s870_s17, %s864_s22 }
  0x73   : > { %p873_p12 = por %p872_p9, %p871_p7 }
  0x74   : > { %656 = vmatpush3.bf16.msra.mxu0 %v764_v3  ;;  %676 = vmatpush3.bf16.msra.mxu1 %v772_v8 }
  0x75   : > { %657 = vmatprep.subr.bf16.mxu0 %v941_v0  ;;  %677 = vmatprep.subr.bf16.mxu1 %v941_v0  ;;  %p874_p2 = pnand %p873_p12, %p867_p3 }
  0x78   : > { %658 = vmatpush3.bf16.msra.mxu0 %v765_v5  ;;  %678 = vmatpush3.bf16.msra.mxu1 %v773_v10 }
  0x79   : > { %659 = vmatprep.subr.bf16.mxu0 %v941_v0  ;;  %679 = vmatprep.subr.bf16.mxu1 %v941_v0 }
  0x7c   : > { %660 = vmatpush3.bf16.msra.mxu0 %v766_v7  ;;  %680 = vmatpush3.bf16.msra.mxu1 %v774_v12 }
  0x7d   : > { %661 = vmatprep.subr.bf16.mxu0 %v941_v0  ;;  %681 = vmatprep.subr.bf16.mxu1 %v941_v0 }
  0x80   : > { %662 = vmatpush3.bf16.msra.mxu0 %v767_v9  ;;  %682 = vmatpush3.bf16.msra.mxu1 %v775_v14 }
  0x81   : > { %663 = vmatprep.subr.bf16.mxu0 %v941_v0  ;;  %683 = vmatprep.subr.bf16.mxu1 %v941_v0 }
  0x84   : > { %664 = vmatpush3.bf16.msra.mxu0 %v768_v11  ;;  %684 = vmatpush3.bf16.msra.mxu1 %v776_v16 }
  0x85   : > { %665 = vmatprep.subr.bf16.mxu0 %v941_v0  ;;  %685 = vmatprep.subr.bf16.mxu1 %v941_v0 }
  0x88   : > { %666 = vmatpush3.bf16.msra.mxu0 %v769_v13  ;;  %686 = vmatpush3.bf16.msra.mxu1 %v777_v17 }
  0x8b   : > { %668 = vmatmul.mubr.bf16.vlgmr.msra.gmra.mrb[0].mxu0 %v270_v15 }
 0x15e   : > { %v376_v19 = vpop.f32.mrb[0].mxu0 }
 0x15f   : > { %v377_v20 = vadd.f32 %v611_v18, %v376_v19  ;;  %v669_v21 = vpop.f32.mrb[1].mxu0 }
 0x160   : > { %v379_v22 = vpop.f32.mrb[2].mxu0 }
 0x161   : > { %v382_v23 = vmax.f32 %v377_v20, 0.0  ;;  %v670_v24 = vpop.f32.mrb[3].mxu0 }
 0x163   : > { %v383_v25 = vpack.c.bf16 %v382_v23, %v382_v23 }
 0x165   : > { %688 = vmatmul.mubr.bf16.vlgmr.msra.gmra.mrb[0].mxu1 %v383_v25 }
 0x238   : > { %v489_v27 = vpop.f32.mrb[0].mxu1 }
 0x239   : > { %v490_v28 = vadd.f32 %v620_v26, %v489_v27  ;;  %v689_v29 = vpop.f32.mrb[1].mxu1 }
 0x23a   : > { %v492_v30 = vpop.f32.mrb[2].mxu1 }
 0x23b   : > { %495 = vst [vmem:[%s268_s7] sm:$0xff] %v490_v28  ;;  %v690_v31 = vpop.f32.mrb[3].mxu1 }
 0x23c   : > { %877 = shalt.err (!%p874_p2)
}
 0x23d   : > { %s878_s12 = scalar_lea.hbm %s1169_s16, 128  ;;  %s882_s8 = scalar_lea.hbm %s1218_s5, 256 }
 0x23e   : > { %p879_p13 = scmp.ne.s32.totalorder %s1169_s16, %s878_s12  ;;  %p883_p4 = scmp.lt.u32.totalorder %s1169_s16, %s1218_s5 }
 0x23f   : > { %p884_p5 = scmp.lt.u32.totalorder %s882_s8, %s878_s12  ;;  %p886_p11 = scmp.lt.u32.totalorder %s878_s12, %s1169_s16 }
 0x240   : > { %p880_p6 = pnand %p879_p13, %p1232_p0 }
 0x241   : > { %p885_p8 = por %p884_p5, %p883_p4 }
 0x242   : > { %p881_p10 = pneg %p880_p6 }
 0x243   : > { %p887_p1 = por %p886_p11, %p885_p8 }
 0x245   : > { %p888_p3 = pnand %p887_p1, %p881_p10 }
 0x247   : > { %891 = shalt.err (!%p888_p3)
}
 0x248   : > { %701 = dma.vmem_to_hbm [thread:$0]  (%p1232_p0), %s1171_s6, 128, %s1169_s16, %s497_s9  }
 0x249 PF: > { %s522_s28 = sand.u32 1, %s922_s18   ;;  %p1233_p7 = scmp.ne.s32.totalorder %s1223_s25, 0 }
 0x24a   : > { %p1234_p9 = scmp.ge.s32.totalorder %s934_s21, 2  ;;  %s523_s7 = scalar_lea.sflag [#allocation4], %s522_s28 }
 0x24c   : > { %p715_p12 = pnand %p1234_p9, %p1233_p7 }
 0x24e   : > { %917 = dma.done.wait (!%p715_p12), %s523_s7, 128  }
 0x24f   : > { %919 = vsyncadd (!%p715_p12), %s523_s7, 4294967168  ;;  %p19_p2 = scmp.ge.s32.totalorder %s1084_s14, 4   ;;  %s1235_s18 = smov %s926_s19 }
 0x250   : > { %s1236_s19 = smov %s930_s20  ;;  %s1237_s20 = smov %s1100_s27 }
 0x251   : > { %s1238_s21 = smov %s1084_s14  ;;  %21 = sbr.rel (!%p19_p2) target bundleno = 6 (0x6), region = 93 }
 0x258   :  { %528 = vsyncpa [#allocation3], 1 }
 0x259   :  { %530 = vsyncpa [#allocation3 + $0x1], 1 }
 0x25a   :  { %531 = vsyncpa [#allocation6], 1 }
 0x25b   :  { %532 = vsyncpa [#allocation4], 1 }
 0x25c   :  { %534 = vsyncpa [#allocation4 + $0x1], 1 }

</bundles_post_ra>
